<compile_context>
chip_gen: v6e
topology: v6e:2x2x1
jax: 0.10.0
libtpu: 0.0.40
codegen_flags: <defaults>
</compile_context>

<pallas_src>
import functools
import math

import jax
import jax.numpy as jnp
from jax.experimental import pallas as pl
from jax.experimental.pallas import tpu as pltpu


def _round_up(x, m):
    return ((x + m - 1) // m) * m


# ----------------------------- Pallas kernels ------------------------------

def gram_stats_kernel(rows_ref, colsum_ref, gram_ref):
    # rows_ref: (tm, Kd) bf16.  Emits per-tile column sums and the Gram matrix
    # rows^T rows (f32 accumulation on the MXU).  Zero-padded rows contribute
    # exactly zero to both, so padding never biases the statistics.
    r = rows_ref[...]                                               # (tm, Kd) bf16
    gram = jax.lax.dot_general(
        r, r, (((0,), (0,)), ((), ())),
        preferred_element_type=jnp.float32)                         # (Kd, Kd) f32
    gram_ref[...] = gram[None]                                      # (1, Kd, Kd)
    colsum_ref[...] = jnp.sum(r.astype(jnp.float32), axis=0,
                              keepdims=True)[None]                  # (1, 1, Kd)


def conv_bn_sigmoid_kernel(rows_ref, w_ref, bias_ref, pose_ref, act_ref, *, bpp):
    # Folded conv + BN + sigmoid, bf16 MXU feed, f32 accumulation:
    #   y = rows @ (w * inv_std) + (-mean * inv_std)
    # Pose lanes [0, bpp) are written as-is; activation lanes [bpp, C_out) get
    # the sigmoid.  Two lane-dense outputs avoid a full-width select/mask.
    y = jnp.dot(rows_ref[...], w_ref[...],
                preferred_element_type=jnp.float32)                 # (tm, C_out) f32
    y = y + bias_ref[...]
    pose_ref[...] = y[:, :bpp].astype(pose_ref.dtype)
    act_ref[...] = jax.nn.sigmoid(y[:, bpp:]).astype(act_ref.dtype)


# ------------------------------- Wrappers -----------------------------------

def pallas_gram_stats(rows, tm):
    """rows: (Mp, Kd) bf16 -> per-tile (colsum (T,1,Kd), gram (T,Kd,Kd)) f32."""
    Mp, Kd = rows.shape
    T = Mp // tm
    return pl.pallas_call(
        gram_stats_kernel,
        out_shape=(jax.ShapeDtypeStruct((T, 1, Kd), jnp.float32),
                   jax.ShapeDtypeStruct((T, Kd, Kd), jnp.float32)),
        grid=(T,),
        in_specs=[pl.BlockSpec((tm, Kd), lambda i: (i, 0))],
        out_specs=(pl.BlockSpec((1, 1, Kd), lambda i: (i, 0, 0)),
                   pl.BlockSpec((1, Kd, Kd), lambda i: (i, 0, 0))),
        compiler_params=pltpu.CompilerParams(
            dimension_semantics=("parallel",)),
    )(rows)


def pallas_conv_bn_sigmoid(rows, w_scaled, bias, bpp, tm, out_dtype):
    """rows: (Mp, Kd) bf16; w_scaled: (Kd, C_out) bf16; bias: (1, C_out) f32.

    Returns (poses (Mp, bpp), activations (Mp, C_out - bpp)) in out_dtype.
    """
    Mp, Kd = rows.shape
    C_out = w_scaled.shape[1]
    n_act = C_out - bpp
    T = Mp // tm
    kernel = functools.partial(conv_bn_sigmoid_kernel, bpp=bpp)
    return pl.pallas_call(
        kernel,
        out_shape=(jax.ShapeDtypeStruct((Mp, bpp), out_dtype),
                   jax.ShapeDtypeStruct((Mp, n_act), out_dtype)),
        grid=(T,),
        in_specs=[
            pl.BlockSpec((tm, Kd), lambda i: (i, 0)),
            pl.BlockSpec((Kd, C_out), lambda i: (0, 0)),   # resident (same block)
            pl.BlockSpec((1, C_out), lambda i: (0, 0)),    # resident (same block)
        ],
        out_specs=(
            pl.BlockSpec((tm, bpp), lambda i: (i, 0)),
            pl.BlockSpec((tm, n_act), lambda i: (i, 0)),
        ),
        compiler_params=pltpu.CompilerParams(
            dimension_semantics=("parallel",)),
    )(rows, w_scaled, bias)


def _xavier_uniform(key, shape):
    # torch xavier_uniform_ for conv weight (out, in, k, k)
    out_ch, in_ch, kh, kw = shape
    fan_in = in_ch * kh * kw
    fan_out = out_ch * kh * kw
    bound = math.sqrt(6.0 / (fan_in + fan_out))
    return jax.random.uniform(key, shape, minval=-bound, maxval=bound,
                              dtype=jnp.float32)


class PrimaryCapsules2DPallas:
    """feature=False variant of the PyTorch PrimaryCapsules2D."""

    def __init__(self, in_channels, out_caps, pose_dim, kernel_size, stride,
                 padding=0, key=None, tm_max=4096, out_dtype=jnp.float32):
        self.A, self.B, self.P = in_channels, out_caps, pose_dim
        self.K, self.S, self.conv_pad = kernel_size, stride, padding
        self.tm_max = tm_max
        self.out_dtype = out_dtype
        k1, k2 = jax.random.split(key, 2)
        w_kernel = _xavier_uniform(k1, (self.B * self.P * self.P, self.A,
                                        self.K, self.K))
        a_kernel = _xavier_uniform(k2, (self.B, self.A, self.K, self.K))
        # weight: (B*P*P + B, A, K, K)  (same concat order as the torch module)
        self.weight = jnp.concatenate([w_kernel, a_kernel], axis=0)
        C_out = self.B * self.P * self.P + self.B
        # Permute to match the (i, j, a) row ordering produced by _im2col:
        # row index = (i*K + j)*A + a  ->  (K*K*A, C_out) matrix.
        # Kept in f32 for the (tiny) stats glue; the BN-folded copy used by the
        # main matmul is cast to bf16 per call.
        self.w_mat = (self.weight.transpose(0, 2, 3, 1)
                      .reshape(C_out, self.K * self.K * self.A).T
                      .astype(jnp.float32))
        self.eps = 1e-5
        # TODO(synk): BN running-stat buffer updates / learned affine params are
        # not modeled (fresh torch module: weight=1, bias=0 -> identity affine);
        # only training-mode batch statistics are reproduced here.

    # -- im2col: NHWC slicing + lane-axis concat (no big relayout), bf16 rows --
    # TODO(synk): longer term, gather patches inside the kernel (memory_space=
    # pl.ANY + manual DMA) or via conv_general_dilated_patches so the (M, Kd)
    # rows array never round-trips through HBM.
    def _im2col(self, x):
        K, S, pad = self.K, self.S, self.conv_pad
        x = x.astype(jnp.bfloat16)
        x = jnp.transpose(x, (0, 2, 3, 1))                # NCHW -> NHWC (small)
        if pad:
            x = jnp.pad(x, ((0, 0), (pad, pad), (pad, pad), (0, 0)))
        N, H, W, A = x.shape
        Ho = (H - K) // S + 1
        Wo = (W - K) // S + 1
        slices = []
        for i in range(K):
            for j in range(K):
                slices.append(x[:, i:i + S * Ho:S, j:j + S * Wo:S, :])
        rows = jnp.concatenate(slices, axis=-1)           # (N,Ho,Wo,K*K*A)
        rows = rows.reshape(N * Ho * Wo, K * K * A)
        M = rows.shape[0]
        # Balanced row tile: tm <= tm_max, and T >= 2 so both TensorCores of a
        # v7x megacore get work even when M is small.
        num_tiles = max(2, -(-M // self.tm_max))          # cdiv, forced >= 2
        tm = _round_up(-(-M // num_tiles), 16)
        Mp = tm * num_tiles
        if Mp != M:                                       # pad once, in bf16
            rows = jnp.pad(rows, ((0, Mp - M), (0, 0)))
        return rows, Ho, Wo, M, tm

    def __call__(self, x):
        # x: (N, A, H, W) NCHW, float32
        N = x.shape[0]
        B, P = self.B, self.P
        PP = P * P
        BPP = B * PP
        C_out = BPP + B

        rows, Ho, Wo, M, tm = self._im2col(x)             # (Mp, A*K*K) bf16

        # --- pass 1: per-tile column sums + Gram matrix of the rows ---------
        psum, pgram = pallas_gram_stats(rows, tm)
        colsum = psum.sum(axis=(0, 1))                    # (Kd,)
        gram = pgram.sum(axis=0)                          # (Kd, Kd)

        # Recover per-channel conv-output sums / sums-of-squares (tiny glue):
        #   ch_sum[c]  = colsum . w[:, c]
        #   ch_ssq[c]  = w[:, c]^T G w[:, c]
        w = self.w_mat                                    # (Kd, C_out) f32
        ch_sum = colsum @ w                               # (C_out,)
        ch_ssq = jnp.sum(w * (gram @ w), axis=0)          # (C_out,)

        # --- BatchNorm batch statistics (training mode, biased variance) ----
        # BN_p (BatchNorm3d over B capsules): stats over (N, P*P, Ho, Wo).
        denom_p = float(M * PP)
        pose_mean = ch_sum[:BPP].reshape(B, PP).sum(axis=1) / denom_p
        pose_var = jnp.maximum(
            ch_ssq[:BPP].reshape(B, PP).sum(axis=1) / denom_p - pose_mean ** 2,
            0.0)
        # BN_a (BatchNorm2d over B channels): stats over (N, Ho, Wo).
        act_mean = ch_sum[BPP:] / float(M)
        act_var = jnp.maximum(ch_ssq[BPP:] / float(M) - act_mean ** 2, 0.0)

        inv_pose = jax.lax.rsqrt(pose_var + self.eps)
        inv_act = jax.lax.rsqrt(act_var + self.eps)
        scale = jnp.concatenate([jnp.repeat(inv_pose, PP), inv_act])   # (C_out,)
        mean = jnp.concatenate([jnp.repeat(pose_mean, PP), act_mean])  # (C_out,)
        bias = (-mean * scale).reshape(1, C_out).astype(jnp.float32)
        w_scaled = (self.w_mat * scale[None, :]).astype(jnp.bfloat16)  # fold BN

        # --- pass 2: fused conv + BN affine + sigmoid (split lane-dense out) -
        pose_flat, act_flat = pallas_conv_bn_sigmoid(
            rows, w_scaled, bias, BPP, tm, self.out_dtype)

        poses = pose_flat[:M].reshape(N, Ho, Wo, B, P, P)
        poses = poses.transpose(0, 3, 4, 5, 1, 2)          # (N, B, P, P, Ho, Wo)
        activations = act_flat[:M].reshape(N, Ho, Wo, B)
        activations = activations.transpose(0, 3, 1, 2)    # (N, B, Ho, Wo)
        return activations, poses


# --------------------------------- Main --------------------------------------

if __name__ == "__main__":
    key = jax.random.PRNGKey(0)
    kx, kw = jax.random.split(key)

    # Small shapes consistent with the module.
    N, A, H, W = 2, 4, 16, 16
    B, P, K, S = 8, 4, 3, 2   # out_caps, pose_dim, kernel, stride

    x = jax.random.normal(kx, (N, A, H, W), dtype=jnp.float32)

    module = PrimaryCapsules2DPallas(in_channels=A, out_caps=B, pose_dim=P,
                                     kernel_size=K, stride=S, padding=0,
                                     key=kw)
    activations, poses = module(x)
    jax.block_until_ready((activations, poses))

    Ho = (H - K) // S + 1
    Wo = (W - K) // S + 1
    assert activations.shape == (N, B, Ho, Wo), activations.shape
    assert poses.shape == (N, B, P, P, Ho, Wo), poses.shape
    assert bool(jnp.all(jnp.isfinite(activations)))
    assert bool(jnp.all(jnp.isfinite(poses)))
    # sigmoid output range sanity check
    assert bool(jnp.all((activations >= 0.0) & (activations <= 1.0)))

    print("KERNEL_OK")
</pallas_src>

<mosaic_0001>
module attributes {stable_mosaic.version = 11 : i64} {
  func.func @gram_stats_kernel(%arg0: i32, %arg1: memref<64x36xbf16, #tpu.memory_space<vmem>>, %arg2: memref<1x1x36xf32, #tpu.memory_space<vmem>>, %arg3: memref<1x36x36xf32, #tpu.memory_space<vmem>>) attributes {dimension_semantics = [#tpu.dimension_semantics<parallel>], iteration_bounds = array<i64: 2>, scalar_prefetch = 0 : i64, scratch_operands = 0 : i64, tpu.core_type = #tpu.core_type<tc>, window_params = [{transform_indices = @transform_0, window_bounds = array<i64: 64, 36>}, {transform_indices = @transform_1, window_bounds = array<i64: 1, 1, 36>}, {transform_indices = @transform_2, window_bounds = array<i64: 1, 36, 36>}]} {
    %c0 = arith.constant 0 : index
    %c0_0 = arith.constant 0 : index
    %0 = vector.load %arg1[%c0, %c0_0] : memref<64x36xbf16, #tpu.memory_space<vmem>>, vector<64x36xbf16>
    %cst = arith.constant dense<0.000000e+00> : vector<36x36xf32>
    %1 = tpu.matmul %0, %0, %cst {dimension_numbers = #tpu.dot_dimension_numbers<[0], [0], [1], [1], [0, 1, 1, 1], [], []>} : vector<64x36xbf16>, vector<64x36xbf16>, vector<36x36xf32> -> vector<36x36xf32>
    %2 = vector.shape_cast %1 : vector<36x36xf32> to vector<1x36x36xf32>
    %c0_1 = arith.constant 0 : index
    %c0_2 = arith.constant 0 : index
    %c0_3 = arith.constant 0 : index
    %3 = vector.load %arg3[%c0_1, %c0_2, %c0_3] : memref<1x36x36xf32, #tpu.memory_space<vmem>>, vector<1x36x36xf32>
    tpu.vector_store %arg3[%c0_1, %c0_2, %c0_3], %2 {strides = array<i32>} : memref<1x36x36xf32, #tpu.memory_space<vmem>>, vector<1x36x36xf32>,
    %4 = arith.extf %0 : vector<64x36xbf16> to vector<64x36xf32>
    %cst_4 = arith.constant dense<0.000000e+00> : vector<36xf32>
    %5 = vector.multi_reduction <add>, %4, %cst_4 [0] : vector<64x36xf32> to vector<36xf32>
    %6 = vector.shape_cast %5 : vector<36xf32> to vector<1x36xf32>
    %7 = vector.shape_cast %6 : vector<1x36xf32> to vector<1x1x36xf32>
    %c0_5 = arith.constant 0 : index
    %c0_6 = arith.constant 0 : index
    %c0_7 = arith.constant 0 : index
    %8 = vector.load %arg2[%c0_5, %c0_6, %c0_7] : memref<1x1x36xf32, #tpu.memory_space<vmem>>, vector<1x1x36xf32>
    tpu.vector_store %arg2[%c0_5, %c0_6, %c0_7], %7 {strides = array<i32>} : memref<1x1x36xf32, #tpu.memory_space<vmem>>, vector<1x1x36xf32>,
    return
  }
  func.func @transform_0(%arg0: i32) -> (i32, i32) {
    %c0_i32 = arith.constant 0 : i32
    %c0_i32_0 = arith.constant 0 : i32
    return %arg0, %c0_i32 : i32, i32
  }
  func.func @transform_1(%arg0: i32) -> (i32, i32, i32) {
    %c0_i32 = arith.constant 0 : i32
    %c0_i32_0 = arith.constant 0 : i32
    %c0_i32_1 = arith.constant 0 : i32
    return %arg0, %c0_i32, %c0_i32_0 : i32, i32, i32
  }
  func.func @transform_2(%arg0: i32) -> (i32, i32, i32) {
    %c0_i32 = arith.constant 0 : i32
    %c0_i32_0 = arith.constant 0 : i32
    %c0_i32_1 = arith.constant 0 : i32
    return %arg0, %c0_i32, %c0_i32_0 : i32, i32, i32
  }
}

</mosaic_0001>

<bundles_post_ra>
// kernel: tpu_custom_call.1
= control target key start
LH: loop header
LB: loop body
LE: loop exit
PB: predicated region body
PF: predicated region fallthrough
CT: control target
= control target key end

     0   :  { %8 = vsyncpa [#allocation3], 0  ;;  %s699_s0 = inlined_call_operand.vmem [shape: bf16[128,36], index: 0, kind: input, shape index: {}]   ;;  %s700_s1 = inlined_call_operand.hbm [shape: f32[2,1,36], index: 1, kind: output, shape index: {0}]   ;;  %s701_s2 = inlined_call_operand.vmem [shape: f32[2,36,36], index: 2, kind: output, shape index: {1}]  }
   0x1   :  { %10 = vsyncpa [#allocation3 + $0x1], 0  ;;  %s593_s9 = smov 0   ;;  %s595_s10 = smov 0  }
   0x2   :  { %s597_s11 = smov 0   ;;  %s599_s12 = smov 0  }
   0x3 LB: > { %s614_s13 = sadd.s32 4294967295, %s573_s12   ;;  %s410_s14 = sadd.s32 4294967294, %s573_s12   ;;  %s573_s12 = sphi %s599_s12, %s707_s12   ;;  %s569_s11 = sphi %s597_s11, %s706_s11   ;;  %s565_s10 = sphi %s595_s10, %s705_s10   ;;  %s561_s9 = sphi %s593_s9, %s704_s9  }
   0x4   : > { %s618_s15 = sadd.s32 1, %s573_s12   ;;  %s49_s16 = sadd.s32 1, %s569_s11 }
   0x5   : > { %s46_s17 = ssub.s32 %s573_s12, %s618_s15  ;;  %p59_p0 = scmp.ne.s32.totalorder %s569_s11, %s565_s10 }
   0x6   : > { %p47_p1 = scmp.eq.s32.totalorder %s46_s17, 0  ;;  %p60_p2 = scmp.eq.s32.totalorder %s614_s13, 1 }
   0x7   : > { %p65_p3 = scmp.ne.s32.totalorder %s565_s10, %s561_s9  ;;  %p66_p4 = scmp.eq.s32.totalorder %s410_s14, 1 }
   0x8   : > { %s629_s18 = scalar_select %p47_p1, %s569_s11, %s49_s16  }
   0x9   : > { %p631_p5 = por %p60_p2, %p59_p0  ;;  %p635_p6 = por %p66_p4, %p65_p3 }
   0xa   : > { %p413_p7 = scmp.ge.s32.totalorder %s573_s12, 1  ;;  %p119_p8 = scmp.lt.s32.totalorder %s573_s12, 3 }
   0xc   : > { %p120_p9 = pnand %p413_p7, %p119_p8 }
   0xd   : > { %s414_s21 = sshll.u32 (!%p120_p9), %s614_s13, 3  ;;  %s136_s26 = sand.u32 (!%p120_p9), 1, %s565_s10  }
   0xe   : > { %123 = sbr.rel (%p120_p9) target bundleno = 333 (0x14d), region = 24  ;;  %p146_p10 = scmp.lt.s32.totalorder (!%p120_p9), %s414_s21, 15 }
   0xf   : > { %s424_s27 = sshll.u32 (!%p120_p9), %s614_s13, 4  ;;  %s137_s28 = scalar_lea.vmem (!%p120_p9), [#allocation2], %s136_s26 }
  0x10   : > { %s327_s29 = sshll.u32 (!%p120_p9), %s137_s28, 4  ;;  %s325_s4 = scalar_lea.hbm (!%p120_p9), %s700_s1, %s424_s27  ;;  %s328_s29 = int_to_ptr.vmem [resolvable:$true] %s327_s29 }
  0x11   : > { %s310_s5 = scalar_lea.sflag (!%p120_p9), [#allocation3], %s136_s26  ;;  %s513_s6 = scalar_lea.vmem (!%p120_p9), %s328_s29, 16 }
  0x12   : > { %p514_p11 = scmp.ne.s32.totalorder (!%p120_p9), %s328_s29, %s513_s6  ;;  %s577_s7 = smov (!%p120_p9), [#allocation2]  }
  0x13   : > { %v575_v0 = vmov 0.0   ;;  %vm576_vm0 = vmmov 0   ;;  %s709_s21 = smov (!%p146_p10, %s414_s21), 15  ;;  %vm271_vm1 = vcmask 293888   ;;  %vm205_vm2 = vcmask 523264   ;;  %s517_s8 = sshll.u32 %s577_s7, 4  ;;  %s518_s8 = int_to_ptr.vmem [resolvable:$false] %s517_s8 }
  0x14   : > { %434 = vmatprep.subr.bf16.mxu0 %v575_v0  ;;  %454 = vmatprep.subr.bf16.mxu1 %v575_v0  ;;  %s415_s22 = sshll.u32 %s709_s21, 2  ;;  %vm307_vm3 = vcmask 286720   ;;  %p515_p12 = pnand %p514_p11, %p631_p5 }
  0x15   : > { %442 = vmatprep.mubr.msk.bf16.mxu0 %vm576_vm0, %v575_v0  ;;  %446 = vmatprep.mubr.msk.bf16.mxu1 %vm576_vm0, %v575_v0  ;;  %s149_s25 = scalar_lea.vmem %s699_s0, %s415_s22  ;;  %s519_s14 = scalar_lea.vmem %s518_s8, 32 }
  0x16   : > { %v157_v1 = vld [vmem:[%s149_s25] sm:$0xff]   ;;  %v159_v2 = vld [vmem:[%s149_s25 + $0x8] sm:$0xff]   ;;  %v163_v5 = vld [vmem:[%s149_s25 + $0x18] sm:$0xff]   ;;  %p516_p13 = pneg %p515_p12  ;;  %p520_p0 = scmp.lt.s32.totalorder %s328_s29, %s518_s8 }
  0x17   : > { %v278_v3 = vunpack.c.l.bf16 %v157_v1  ;;  %v279_v4 = vunpack.c.h.bf16 %v157_v1  ;;  %v280_v6 = vunpack.c.l.bf16 %v159_v2  ;;  %v281_v7 = vunpack.c.h.bf16 %v159_v2  ;;  %v161_v8 = vld [vmem:[%s149_s25 + $0x10] sm:$0xff]   ;;  %189 = vxpose.xlu0.c.b16.start [1/4] (short) (narrow) %v157_v1, 48  ;;  %435 = vmatpush3.bf16.msra.mxu0 %v163_v5  ;;  %p521_p1 = scmp.lt.s32.totalorder %s519_s14, %s513_s6 }
  0x18   : > { %v282_v11 = vunpack.c.l.bf16 %v161_v8  ;;  %v283_v15 = vunpack.c.h.bf16 %v161_v8  ;;  %458 = vmatpush3.bf16.msra.mxu1 %v163_v5  ;;  %436 = vmatprep.subr.bf16.mxu0 %v575_v0  ;;  %v284_v18 = vunpack.c.l.bf16 %v163_v5  ;;  %v285_v21 = vunpack.c.h.bf16 %v163_v5 }
  0x19   : > { %v286_v9 = vsel %vm271_vm1, %v278_v3, 0.0  ;;  %v287_v10 = vsel %vm271_vm1, %v279_v4, 0.0  ;;  %v289_v13 = vsel %vm271_vm1, %v280_v6, 0.0  ;;  %v291_v14 = vsel %vm271_vm1, %v281_v7, 0.0  ;;  %455 = vmatprep.subr.bf16.mxu1 %v575_v0  ;;  %p522_p2 = por %p521_p1, %p520_p0 }
  0x1a   : > { %v288_v12 = vadd.f32 %v287_v10, %v286_v9  ;;  %v293_v17 = vsel %vm271_vm1, %v282_v11, 0.0  ;;  %v295_v20 = vsel %vm271_vm1, %v283_v15, 0.0  ;;  %v297_v23 = vsel %vm271_vm1, %v284_v18, 0.0 }
  0x1b   : > { %190 = vxpose.xlu0.c.b16.cont [2/4] (short) (narrow) %v159_v2, 48  ;;  %437 = vmatpush3.bf16.msra.mxu0 %v161_v8  ;;  %v299_v25 = vsel %vm271_vm1, %v285_v21, 0.0  ;;  %p523_p3 = pnand %p522_p2, %p516_p13 }
  0x1c   : > { %v290_v16 = vadd.f32 %v289_v13, %v288_v12  ;;  %459 = vmatpush3.bf16.msra.mxu1 %v161_v8  ;;  %438 = vmatprep.subr.bf16.mxu0 %v575_v0 }
  0x1d   : > { %456 = vmatprep.subr.bf16.mxu1 %v575_v0 }
  0x1e   : > { %v292_v19 = vadd.f32 %v291_v14, %v290_v16 }
  0x1f   : > { %191 = vxpose.xlu0.c.b16.cont [3/4] (short) (narrow) %v161_v8, 48  ;;  %439 = vmatpush3.bf16.msra.mxu0 %v159_v2 }
  0x20   : > { %v294_v22 = vadd.f32 %v293_v17, %v292_v19  ;;  %460 = vmatpush3.bf16.msra.mxu1 %v159_v2  ;;  %440 = vmatprep.subr.bf16.mxu0 %v575_v0 }
  0x21   : > { %457 = vmatprep.subr.bf16.mxu1 %v575_v0 }
  0x22   : > { %v296_v24 = vadd.f32 %v295_v20, %v294_v22 }
  0x23   : > { %192 = vxpose.xlu0.c.b16.end [4/4] (short) (narrow) %v163_v5, 48  ;;  %441 = vmatpush3.bf16.msra.mxu0 %v157_v1 }
  0x24   : > { %v298_v26 = vadd.f32 %v297_v23, %v296_v24  ;;  %461 = vmatpush3.bf16.msra.mxu1 %v157_v1 }
  0x26   : > { %v300_v27 = vadd.f32 %v299_v25, %v298_v26 }
  0x28   : > { %v301_v31 = vrot.slane %v300_v27, 4 }
  0x2a   : > { %v302_v32 = vadd.f32 %v301_v31, %v300_v27 }
  0x2c   : > { %v303_v33 = vrot.slane %v302_v32, 2 }
  0x2e   : > { %v304_v34 = vadd.f32 %v303_v33, %v302_v32 }
  0x30   : > { %v305_v35 = vrot.slane %v304_v34, 1 }
  0x32   : > { %v306_v36 = vadd.f32 %v305_v35, %v304_v34 }
  0x34   : > { %308 = vst.msk [vmem:[%s137_s28] sm:$0x1] %vm307_vm3, %v306_v36 }
  0x79   : > { %v197_v28 = vpop.trf.xlu0 }
  0x7a   : > { %443 = vmatmul.mubr.msk.bf16.vlgmr.msra.gmra.mxu0 %vm205_vm2, %v197_v28 }
  0x7d   : > { %v198_v29 = vpop.trf.xlu0 }
  0x7e   : > { %447 = vmatmul.mubr.msk.bf16.vlgmr.msra.gmra.mxu1 %vm205_vm2, %v198_v29 }
  0x7f   : > { %450 = vmatprep.mubr.msk.bf16.mxu1 %vm576_vm0, %v575_v0 }
  0x81   : > { %v199_v30 = vpop.trf.xlu0 }
  0x86   : > { %451 = vmatmul.mubr.msk.bf16.gmra.mxu1 %vm205_vm2, %v199_v30 }
  0x87   : > { %526 = shalt.err (!%p523_p3)
}
  0x88   : > { %s527_s16 = scalar_lea.hbm %s325_s4, 16  ;;  %s531_s22 = scalar_lea.hbm %s700_s1, 32 }
  0x89   : > { %p528_p4 = scmp.ne.s32.totalorder %s325_s4, %s527_s16  ;;  %p532_p9 = scmp.lt.s32.totalorder %s325_s4, %s700_s1 }
  0x8a   : > { %p533_p10 = scmp.lt.s32.totalorder %s531_s22, %s527_s16 }
  0x8b   : > { %p529_p7 = pnand %p528_p4, %p631_p5 }
  0x8c   : > { %p534_p11 = por %p533_p10, %p532_p9 }
  0x8d   : > { %p530_p8 = pneg %p529_p7 }
  0x8f   : > { %p535_p12 = pnand %p534_p11, %p530_p8 }
  0x91   : > { %538 = shalt.err (!%p535_p12)
}
  0x92   : > { %463 = dma.vmem_to_hbm [thread:$0]  (%p631_p5), %s328_s29, 16, %s325_s4, %s310_s5   ;;  %vm276_vm4 = vcmask 289792  }
  0x93   : > { %p151_p13 = scmp.lt.s32.totalorder %s614_s13, 1 }
  0x95   : > { %s711_s13 = smov (!%p151_p13, %s614_s13), 1 }
  0x96   : > { %s462_s25 = smul.u32 40, %s711_s13 }
  0x98   : > { %s155_s28 = scalar_lea.vmem %s701_s2, %s462_s25 }
 0x13a   : > { %v249_v37 = vpop.f32.mrf.mxu0 }
 0x13b   : > { %272 = vst.msk [vmem:[%s155_s28] sm:$0xff] %vm271_vm1, %v249_v37 }
 0x13c   : > { %v444_v38 = vpop.f32.mrf.mxu0 }
 0x13e   : > { %v252_v39 = vpop.f32.mrf.mxu0  ;;  %v257_v40 = vpop.f32.mrf.mxu1 }
 0x13f   : > { %273 = vst.msk [vmem:[%s155_s28 + $0x8] sm:$0xff] %vm271_vm1, %v252_v39  ;;  %274 = vst.msk [vmem:[%s155_s28 + $0x10] sm:$0xff] %vm271_vm1, %v257_v40 }
 0x140   : > { %v445_v41 = vpop.f32.mrf.mxu0  ;;  %v448_v42 = vpop.f32.mrf.mxu1 }
 0x142   : > { %v260_v43 = vpop.f32.mrf.mxu1 }
 0x143   : > { %275 = vst.msk [vmem:[%s155_s28 + $0x18] sm:$0xff] %vm271_vm1, %v260_v43 }
 0x144   : > { %v449_v44 = vpop.f32.mrf.mxu1 }
 0x146   : > { %v265_v45 = vpop.f32.mrf.mxu1 }
 0x147   : > { %277 = vst.msk [vmem:[%s155_s28 + $0x20] sm:$0xf] %vm276_vm4, %v265_v45 }
 0x148   : > { %v452_v46 = vpop.f32.mrf.mxu1 }
 0x14a   : > { %v268_v47 = vpop.f32.mrf.mxu1 }
 0x14c   : > { %v453_v48 = vpop.f32.mrf.mxu1 }
 0x14d PF: > { %p469_p5 = scmp.ge.s32.totalorder %s573_s12, 2  ;;  %s342_s13 = sand.u32 1, %s561_s9  }
 0x14e   : > { %s343_s19 = scalar_lea.sflag [#allocation3], %s342_s13 }
 0x14f   : > { %p466_p0 = pnand %p469_p5, %p635_p6 }
 0x151   : > { %p467_p1 = pneg %p466_p0 }
 0x153   : > { %556 = dma.done.wait (%p467_p1), %s343_s19, 16  }
 0x154   : > { %558 = vsyncadd (%p467_p1), %s343_s19, 4294967280  ;;  %p13_p2 = scmp.ge.s32.totalorder %s618_s15, 4   ;;  %s704_s9 = smov %s565_s10 }
 0x155   : > { %s705_s10 = smov %s569_s11  ;;  %s706_s11 = smov %s629_s18 }
 0x156   : > { %s707_s12 = smov %s618_s15  ;;  %15 = sbr.rel (!%p13_p2) target bundleno = 3 (0x3), region = 71 }
 0x15b   :  { %355 = vsyncpa [#allocation3], 1 }
 0x15c   :  { %357 = vsyncpa [#allocation3 + $0x1], 1 }

</bundles_post_ra>
